<compile_context>
chip_gen: v5e
topology: v5e:2x2
jax: 0.10.0
libtpu: 0.0.40
codegen_flags: <defaults>
</compile_context>

<pallas_src>
import jax
import jax.numpy as jnp
from jax.experimental import pallas as pl
from jax.experimental.pallas import tpu as pltpu

EPS = 1e-5


def ln_v2_kernel(x_ref, alpha_ref, beta_ref, o_ref):
    x = x_ref[...].astype(jnp.float32)                  # (TM, D) upcast in-kernel
    d = x.shape[-1]
    inv_d = jnp.float32(1.0 / d)

    # Single sweep over the tile for both first and second moments.
    s1 = jnp.sum(x, axis=-1, keepdims=True)             # (TM, 1)
    s2 = jnp.sum(x * x, axis=-1, keepdims=True)         # (TM, 1)
    mean = s1 * inv_d
    var = jnp.maximum(s2 * inv_d - mean * mean, 0.0)    # clamp: E[x^2]-mean^2 >= 0
    inv = jax.lax.rsqrt(var + EPS)                      # EUP; avoids VALU divide

    # Fused affine: out = (x - mean) * inv * alpha + beta == x*scale + shift
    scale = inv * alpha_ref[...]                        # (TM,1)*(1,D) -> (TM,D)
    shift = beta_ref[...] - mean * scale                # (TM,D)
    o_ref[...] = (x * scale + shift).astype(o_ref.dtype)


def _x_tile_budget_bytes():
    # Bigger steps on v7x: ~3.2 TB/s HBM makes the ~0.35us per-step overhead a
    # larger fraction of a small tile's transfer time.  Conservative elsewhere
    # (v5e default scoped VMEM is only 16 MiB).
    try:
        kind = jax.devices()[0].device_kind.lower()
    except Exception:
        kind = ""
    if "v7" in kind:
        return 8 << 20, 56 << 20    # x-tile budget, vmem_limit_bytes
    return 3 << 20, 48 << 20


def _choose_tm(M, D, itemsize, budget_bytes):
    # Sublane granularity for the packed input dtype.
    sub = {4: 8, 2: 16, 1: 32}.get(itemsize, 8)
    if M <= sub:
        return M                                        # full extent is legal
    # Size the row tile from the VMEM budget (native-dtype bytes per x tile).
    tm = max((budget_bytes // max(D * itemsize, 1)) // sub * sub, sub)
    # Never emit a 1-step grid: cap tm so there are >= 4 steps (>= 2 for very
    # small M).  Keeps both v7x TensorCores busy and the pipeline overlapped.
    min_steps = 4 if M >= 4 * sub else 2
    cap = max((M // min_steps) // sub * sub, sub)
    return min(tm, cap)


def ln_v2(x, alpha, beta):
    """LayerNorm over the last axis.  x: (..., D); alpha/beta reshapeable to (D,)."""
    orig_shape = x.shape
    D = orig_shape[-1]
    M = 1
    for s in orig_shape[:-1]:
        M *= s

    x2 = x.reshape(M, D)                                # native dtype, no cast
    a2 = jnp.asarray(alpha, jnp.float32).reshape(1, D)  # tiny, VMEM-resident
    b2 = jnp.asarray(beta, jnp.float32).reshape(1, D)

    budget, vmem_limit = _x_tile_budget_bytes()
    tm = _choose_tm(M, D, jnp.dtype(x.dtype).itemsize, budget)
    grid = (pl.cdiv(M, tm),)   # partial last block OK: rows are independent,
                               # out-of-range output rows are dropped by Pallas.

    out = pl.pallas_call(
        ln_v2_kernel,
        out_shape=jax.ShapeDtypeStruct((M, D), x.dtype),   # native dtype out
        grid_spec=pltpu.PrefetchScalarGridSpec(
            num_scalar_prefetch=0,
            grid=grid,
            in_specs=[
                pl.BlockSpec((tm, D), lambda i: (i, 0)),   # x rows (tiled)
                pl.BlockSpec((1, D), lambda i: (0, 0)),    # alpha (resident)
                pl.BlockSpec((1, D), lambda i: (0, 0)),    # beta  (resident)
            ],
            out_specs=pl.BlockSpec((tm, D), lambda i: (i, 0)),
        ),
        compiler_params=pltpu.CompilerParams(
            dimension_semantics=("parallel",),   # shard rows across TCs (v7x)
            vmem_limit_bytes=vmem_limit,
        ),
    )(x2, a2, b2)
    return out.reshape(orig_shape)


def reference(x, alpha, beta):
    # pure-JAX reference of the PyTorch forward (two-pass, f32)
    xf = x.astype(jnp.float32)
    mean = jnp.mean(xf, axis=-1, keepdims=True)
    var = jnp.mean((xf - mean) ** 2, axis=-1, keepdims=True)
    y = (xf - mean) / jnp.sqrt(var + EPS)
    return (y * alpha + beta).astype(x.dtype)


if __name__ == "__main__":
    B, N, DIM = 2, 16, 32           # x: (batch, seq, dim), LN over dim
    key = jax.random.PRNGKey(0)
    kx, ka, kb = jax.random.split(key, 3)

    x = jax.random.normal(kx, (B, N, DIM), jnp.float32)
    # Module default init is alpha=ones, beta=zeros; random values here also
    # exercise the scale/shift broadcast.
    alpha = jax.random.normal(ka, (1, 1, DIM), jnp.float32)
    beta = jax.random.normal(kb, (1, 1, DIM), jnp.float32)

    out = ln_v2(x, alpha, beta)
    out = jax.block_until_ready(out)

    ref = reference(x, alpha, beta)
    assert out.shape == (B, N, DIM)
    assert out.dtype == x.dtype
    assert jnp.allclose(out, ref, atol=1e-4, rtol=1e-4), "mismatch vs reference"

    # Also exercise the native-dtype path with bf16 input.
    xb = x.astype(jnp.bfloat16)
    outb = jax.block_until_ready(ln_v2(xb, alpha, beta))
    refb = reference(xb, alpha, beta)
    assert outb.dtype == jnp.bfloat16
    assert jnp.allclose(outb.astype(jnp.float32), refb.astype(jnp.float32),
                        atol=3e-2, rtol=3e-2), "bf16 mismatch vs reference"

    print("KERNEL_OK")
</pallas_src>

<mosaic_0001>
module attributes {stable_mosaic.version = 11 : i64} {
  func.func @ln_v2_kernel(%arg0: i32, %arg1: memref<8x32xf32, #tpu.memory_space<vmem>>, %arg2: memref<1x32xf32, #tpu.memory_space<vmem>>, %arg3: memref<1x32xf32, #tpu.memory_space<vmem>>, %arg4: memref<8x32xf32, #tpu.memory_space<vmem>>) attributes {dimension_semantics = [#tpu.dimension_semantics<parallel>], iteration_bounds = array<i64: 4>, scalar_prefetch = 0 : i64, scratch_operands = 0 : i64, tpu.core_type = #tpu.core_type<tc>, window_params = [{transform_indices = @transform_0, window_bounds = array<i64: 8, 32>}, {pipeline_mode = #tpu.pipeline_mode<synchronous>, transform_indices = @transform_1, window_bounds = array<i64: 1, 32>}, {pipeline_mode = #tpu.pipeline_mode<synchronous>, transform_indices = @transform_2, window_bounds = array<i64: 1, 32>}, {transform_indices = @transform_3, window_bounds = array<i64: 8, 32>}]} {
    %c0 = arith.constant 0 : index
    %c0_0 = arith.constant 0 : index
    %0 = vector.load %arg1[%c0, %c0_0] : memref<8x32xf32, #tpu.memory_space<vmem>>, vector<8x32xf32>
    %cst = arith.constant dense<0.000000e+00> : vector<8xf32>
    %1 = vector.multi_reduction <add>, %0, %cst [1] : vector<8x32xf32> to vector<8xf32>
    %2 = vector.shape_cast %1 : vector<8xf32> to vector<8x1xf32>
    %3 = arith.mulf %0, %0 : vector<8x32xf32>
    %cst_1 = arith.constant dense<0.000000e+00> : vector<8xf32>
    %4 = vector.multi_reduction <add>, %3, %cst_1 [1] : vector<8x32xf32> to vector<8xf32>
    %5 = vector.shape_cast %4 : vector<8xf32> to vector<8x1xf32>
    %cst_2 = arith.constant 3.125000e-02 : f32
    %6 = vector.broadcast %cst_2 : f32 to vector<8x1xf32>
    %7 = arith.mulf %2, %6 : vector<8x1xf32>
    %cst_3 = arith.constant 3.125000e-02 : f32
    %8 = vector.broadcast %cst_3 : f32 to vector<8x1xf32>
    %9 = arith.mulf %5, %8 : vector<8x1xf32>
    %10 = arith.mulf %7, %7 : vector<8x1xf32>
    %11 = arith.subf %9, %10 : vector<8x1xf32>
    %cst_4 = arith.constant 0.000000e+00 : f32
    %12 = vector.broadcast %cst_4 : f32 to vector<8x1xf32>
    %13 = arith.maximumf %11, %12 : vector<8x1xf32>
    %cst_5 = arith.constant 9.99999974E-6 : f32
    %14 = vector.broadcast %cst_5 : f32 to vector<8x1xf32>
    %15 = arith.addf %13, %14 : vector<8x1xf32>
    %16 = math.rsqrt %15 : vector<8x1xf32>
    %c0_6 = arith.constant 0 : index
    %c0_7 = arith.constant 0 : index
    %17 = vector.load %arg2[%c0_6, %c0_7] : memref<1x32xf32, #tpu.memory_space<vmem>>, vector<1x32xf32>
    %18 = vector.broadcast %16 : vector<8x1xf32> to vector<8x32xf32>
    %19 = vector.broadcast %17 : vector<1x32xf32> to vector<8x32xf32>
    %20 = arith.mulf %18, %19 : vector<8x32xf32>
    %c0_8 = arith.constant 0 : index
    %c0_9 = arith.constant 0 : index
    %21 = vector.load %arg3[%c0_8, %c0_9] : memref<1x32xf32, #tpu.memory_space<vmem>>, vector<1x32xf32>
    %22 = vector.broadcast %7 : vector<8x1xf32> to vector<8x32xf32>
    %23 = arith.mulf %22, %20 : vector<8x32xf32>
    %24 = vector.broadcast %21 : vector<1x32xf32> to vector<8x32xf32>
    %25 = arith.subf %24, %23 : vector<8x32xf32>
    %26 = arith.mulf %0, %20 : vector<8x32xf32>
    %27 = arith.addf %26, %25 : vector<8x32xf32>
    %c0_10 = arith.constant 0 : index
    %c0_11 = arith.constant 0 : index
    %28 = vector.load %arg4[%c0_10, %c0_11] : memref<8x32xf32, #tpu.memory_space<vmem>>, vector<8x32xf32>
    tpu.vector_store %arg4[%c0_10, %c0_11], %27 {strides = array<i32>} : memref<8x32xf32, #tpu.memory_space<vmem>>, vector<8x32xf32>,
    return
  }
  func.func @transform_0(%arg0: i32) -> (i32, i32) {
    %c0_i32 = arith.constant 0 : i32
    %c0_i32_0 = arith.constant 0 : i32
    return %arg0, %c0_i32 : i32, i32
  }
  func.func @transform_1(%arg0: i32) -> (i32, i32) {
    %c0_i32 = arith.constant 0 : i32
    %c0_i32_0 = arith.constant 0 : i32
    %c0_i32_1 = arith.constant 0 : i32
    return %c0_i32, %c0_i32_0 : i32, i32
  }
  func.func @transform_2(%arg0: i32) -> (i32, i32) {
    %c0_i32 = arith.constant 0 : i32
    %c0_i32_0 = arith.constant 0 : i32
    %c0_i32_1 = arith.constant 0 : i32
    return %c0_i32, %c0_i32_0 : i32, i32
  }
  func.func @transform_3(%arg0: i32) -> (i32, i32) {
    %c0_i32 = arith.constant 0 : i32
    %c0_i32_0 = arith.constant 0 : i32
    return %arg0, %c0_i32 : i32, i32
  }
}

</mosaic_0001>

<bundles_post_ra>
// kernel: tpu_custom_call.1
= control target key start
LH: loop header
LB: loop body
LE: loop exit
PB: predicated region body
PF: predicated region fallthrough
CT: control target
= control target key end

     0   :  { %8 = vsyncpa [#allocation3], 0  ;;  %s712_s0 = inlined_call_operand.hbm [shape: f32[32,32], index: 0, kind: input, shape index: {}]   ;;  %s713_s1 = inlined_call_operand.hbm [shape: f32[1,32], index: 1, kind: input, shape index: {}]   ;;  %s714_s2 = inlined_call_operand.vmem [shape: f32[1,32], index: 2, kind: input, shape index: {}]   ;;  %s715_s3 = inlined_call_operand.hbm [shape: f32[32,32], index: 3, kind: output, shape index: {}]  }
   0x1   :  { %10 = vsyncpa [#allocation3 + $0x1], 0 }
   0x2   :  { %11 = vsyncpa [#allocation6], 0 }
   0x3   :  { %12 = vsyncpa [#allocation4], 0 }
   0x4   :  { %14 = vsyncpa [#allocation4 + $0x1], 0  ;;  %s566_s12 = smov 0   ;;  %s568_s13 = smov 0  }
   0x5   :  { %s570_s14 = smov 0   ;;  %s572_s15 = smov 0  }
   0x6 LB: > { %s587_s16 = sadd.s32 4294967295, %s543_s15   ;;  %s338_s17 = sadd.s32 4294967294, %s543_s15   ;;  %s543_s15 = sphi %s572_s15, %s724_s15   ;;  %s539_s14 = sphi %s570_s14, %s723_s14   ;;  %s535_s13 = sphi %s568_s13, %s722_s13   ;;  %s531_s12 = sphi %s566_s12, %s721_s12  }
   0x7   : > { %p40_p0 = scmp.ne.s32.totalorder %s535_s13, %s531_s12  ;;  %p41_p1 = scmp.eq.s32.totalorder %s587_s16, 0 }
   0x8   : > { %p106_p2 = scmp.eq.s32.totalorder %s587_s16, 3  ;;  %p112_p3 = scmp.eq.s32.totalorder %s338_s17, 3 }
   0x9   : > { %p596_p4 = por %p41_p1, %p40_p0  ;;  %p339_p5 = scmp.ge.s32.totalorder %s543_s15, 1 }
   0xa   : > { %p601_p6 = por %p112_p3, %p40_p0  ;;  %p119_p7 = scmp.lt.s32.totalorder %s543_s15, 5 }
   0xb   : > { %s131_s22 = sshll.u32 %s713_s1, 4  ;;  %s545_s24 = smov [#allocation5]   ;;  %s132_s22 = int_to_ptr.hbm [resolvable:$true] %s131_s22 }
   0xc   : > { %p609_p8 = pnand %p339_p5, %p119_p7  ;;  %s133_s25 = sshll.u32 %s545_s24, 4  ;;  %s134_s25 = int_to_ptr.vmem [resolvable:$true] %s133_s25 }
   0xd   : > { %s618_s26 = sadd.s32 1, %s543_s15   ;;  %s27_s27 = sadd.s32 1, %s539_s14 }
   0xe   : > { %p360_p9 = pneg %p609_p8  ;;  %s24_s28 = ssub.s32 %s543_s15, %s618_s26 }
   0xf   : > { %p25_p11 = scmp.eq.s32.totalorder %s24_s28, 0  ;;  %p34_p12 = scmp.ne.s32.totalorder %s539_s14, %s535_s13 }
  0x10   : > { %p361_p10 = pnand %p360_p9, %p41_p1  ;;  %p35_p13 = scmp.eq.s32.totalorder %s543_s15, 0 }
  0x11   : > { %s627_s29 = scalar_select %p25_p11, %s539_s14, %s27_s27  }
  0x12   : > { %363 = dma.hbm_to_vmem [thread:$0]  (!%p361_p10), %s132_s22, 16, %s134_s25, [#allocation6]  }
  0x13   : > { %p631_p0 = por %p106_p2, %p34_p12  ;;  %p373_p3 = scmp.lt.s32.totalorder %s543_s15, 4 }
  0x14   : > { %s147_s4 = sand.u32 1, %s539_s14   ;;  %s343_s5 = sshll.u32 %s543_s15, 3 }
  0x15   : > { %p36_p5 = por %p35_p13, %p34_p12  ;;  %s342_s6 = sshll.u32 %s147_s4, 3 }
  0x16   : > { %s155_s9 = scalar_lea.hbm %s712_s0, %s343_s5  ;;  %s151_s11 = scalar_lea.vmem [#allocation2], %s342_s6 }
  0x17   : > { %s157_s10 = sshll.u32 %s155_s9, 4  ;;  %s159_s17 = sshll.u32 %s151_s11, 4  ;;  %s158_s10 = int_to_ptr.hbm [resolvable:$true] %s157_s10  ;;  %s160_s17 = int_to_ptr.vmem [resolvable:$true] %s159_s17 }
  0x18   : > { %p641_p7 = pnand %p373_p3, %p36_p5  ;;  %s148_s21 = scalar_lea.sflag [#allocation3], %s147_s4 }
  0x19   : > { %s443_s22 = sshra.s32 %s158_s10, 4  ;;  %s450_s28 = scalar_lea.hbm %s712_s0, 32  ;;  %s444_s22 = int_to_ptr.hbm [resolvable:$true] %s443_s22 }
  0x1a   : > { %s445_s24 = scalar_lea.hbm %s444_s22, 8  ;;  %p447_p9 = pneg %p641_p7 }
  0x1b   : > { %p446_p2 = scmp.ne.s32.totalorder %s444_s22, %s445_s24  ;;  %p451_p12 = scmp.lt.s32.totalorder %s444_s22, %s712_s0 }
  0x1c   : > { %p452_p13 = scmp.lt.s32.totalorder %s450_s28, %s445_s24 }
  0x1d   : > { %p448_p10 = pnand %p447_p9, %p446_p2 }
  0x1e   : > { %p453_p3 = por %p452_p13, %p451_p12 }
  0x1f   : > { %p449_p11 = pneg %p448_p10 }
  0x21   : > { %p454_p5 = pnand %p453_p3, %p449_p11 }
  0x23   : > { %457 = shalt.err (!%p454_p5)
}
  0x24   : > { %367 = dma.hbm_to_vmem [thread:$0]  (!%p641_p7), %s158_s10, 128, %s160_s17, %s148_s21  }
  0x25   : > { %168 = sbr.rel (%p609_p8) target bundleno = 208 (0xd0), region = 32  ;;  %s658_s4 = sand.u32 (!%p609_p8), 1, %s535_s13  }
  0x26   : > { %s345_s7 = sshll.u32 (!%p609_p8), %s658_s4, 3  ;;  %s171_s8 = scalar_lea.sflag (!%p609_p8), [#allocation3], %s658_s4 }
  0x27   : > { %s174_s9 = scalar_lea.vmem (!%p609_p8), [#allocation2], %s345_s7 }
  0x2a   : > { %518 = dma.done.wait (%p596_p4), %s171_s8, 128  }
  0x2b   : > { %520 = vsyncadd (%p596_p4), %s171_s8, 4294967168 }
  0x2c   : > { %522 = dma.done.wait (%p41_p1), [#allocation6], 16  }
  0x2d   : > { %524 = vsyncadd (%p41_p1), [#allocation6], 4294967280  ;;  %vm204_vm0 = vcmask 261120   ;;  %v203_v0 = vld [vmem:[%s174_s9] sm:$0xff]  ;;  %v409_v17 = vld [vmem:[#allocation5] ss:$0 sm:$0xff] }
  0x2e   : > { %v205_v1 = vsel %vm204_vm0, %v203_v0, 0.0  ;;  %v208_v2 = vmul.f32 %v203_v0, %v203_v0  ;;  %s349_s18 = sshll.u32 %s587_s16, 3  ;;  %v410_v20 = vld [vmem:[%s714_s2] ss:$0 sm:$0xff]  ;;  %s202_s21 = scalar_lea.vmem [#allocation7], %s345_s7 }
  0x2f   : > { %206 = vadd.xlane.f32.xlu0 %v205_v1  ;;  %s253_s20 = scalar_lea.hbm %s715_s3, %s349_s18  ;;  %s255_s22 = sshll.u32 %s202_s21, 4  ;;  %s256_s22 = int_to_ptr.vmem [resolvable:$true] %s255_s22 }
  0x30   : > { %v209_v3 = vsel %vm204_vm0, %v208_v2, 0.0  ;;  %s257_s24 = sshll.u32 %s253_s20, 4  ;;  %s243_s16 = scalar_lea.sflag [#allocation4], %s658_s4  ;;  %s258_s24 = int_to_ptr.hbm [resolvable:$true] %s257_s24 }
  0x31   : > { %s487_s25 = sshra.s32 %s258_s24, 4  ;;  %s493_s6 = scalar_lea.hbm %s715_s3, 32  ;;  %s488_s25 = int_to_ptr.hbm [resolvable:$true] %s487_s25 }
  0x32   : > { %s489_s27 = scalar_lea.hbm %s488_s25, 8  ;;  %p494_p7 = scmp.lt.s32.totalorder %s488_s25, %s715_s3 }
  0x33   : > { %p490_p1 = scmp.ne.s32.totalorder %s488_s25, %s489_s27  ;;  %p495_p2 = scmp.lt.s32.totalorder %s493_s6, %s489_s27 }
  0x35   : > { %p491_p4 = pnand %p490_p1, %p631_p0  ;;  %p496_p9 = por %p495_p2, %p494_p7 }
  0x37   : > { %210 = vadd.xlane.f32.xlu0 %v209_v3  ;;  %p492_p8 = pneg %p491_p4 }
  0x39   : > { %p497_p10 = pnand %p496_p9, %p492_p8 }
  0xa2   : > { %v207_v4 = vpop.xlane.xlu0 %206 }
  0xa3   : > { %v212_v5 = vmul.f32 0.03125, %v207_v4 }
  0xa5   : > { %v214_v7 = vmul.f32 %v212_v5, %v212_v5 }
  0xaa   : > { %v211_v6 = vpop.xlane.xlu0 %210 }
  0xab   : > { %v213_v8 = vmul.f32 0.03125, %v211_v6 }
  0xad   : > { %v215_v9 = vsub.f32 %v213_v8, %v214_v7 }
  0xaf   : > { %v216_v10 = vmax.f32 %v215_v9, 0.0 }
  0xb1   : > { %v217_v11 = vadd.f32 1e-05, %v216_v10 }
  0xb3   : > { %411 = vrsqrt.f32 %v217_v11  ;;  %vm224_vm2 = vweird.f32 %v217_v11 }
  0xb9   : > { %v412_v12 = vpop.eup %411 }
  0xba   : > { %v219_v13 = vmul.f32 %v412_v12, %v217_v11  ;;  %vm225_vm1 = vweird.f32 %v412_v12 }
  0xbb   : > { %vm226_vm3 = vmor %vm224_vm2, %vm225_vm1 }
  0xbc   : > { %v220_v14 = vmul.f32 %v412_v12, %v219_v13 }
  0xbe   : > { %v221_v15 = vmul.f32 0.5, %v220_v14 }
  0xc0   : > { %v222_v16 = vsub.f32 1.5, %v221_v15 }
  0xc2   : > { %v223_v18 = vmul.f32 %v412_v12, %v222_v16 }
  0xc4   : > { %v227_v19 = vsel %vm226_vm3, %v412_v12, %v223_v18 }
  0xc5   : > { %v232_v21 = vmul.f32 %v409_v17, %v227_v19 }
  0xc7   : > { %v234_v22 = vmul.f32 %v232_v21, %v212_v5  ;;  %v239_v24 = vmul.f32 %v232_v21, %v203_v0 }
  0xc9   : > { %v238_v23 = vsub.f32 %v410_v20, %v234_v22 }
  0xcb   : > { %v240_v25 = vadd.f32 %v239_v24, %v238_v23 }
  0xcd   : > { %241 = vst.msk [vmem:[%s202_s21] sm:$0xff] %vm204_vm0, %v240_v25 }
  0xce   : > { %500 = shalt.err (!%p497_p10)
}
  0xcf   : > { %358 = dma.vmem_to_hbm [thread:$0]  (%p631_p0), %s256_s22, 128, %s258_s24, %s243_s16  }
  0xd0 PF: > { %p375_p11 = scmp.ge.s32.totalorder %s543_s15, 2  ;;  %s269_s4 = sand.u32 1, %s531_s12  }
  0xd1   : > { %s270_s9 = scalar_lea.sflag [#allocation4], %s269_s4 }
  0xd2   : > { %p369_p12 = pnand %p375_p11, %p601_p6 }
  0xd4   : > { %p370_p13 = pneg %p369_p12 }
  0xd6   : > { %526 = dma.done.wait (%p370_p13), %s270_s9, 128  }
  0xd7   : > { %528 = vsyncadd (%p370_p13), %s270_s9, 4294967168  ;;  %p17_p3 = scmp.ge.s32.totalorder %s618_s26, 6   ;;  %s721_s12 = smov %s535_s13 }
  0xd8   : > { %s722_s13 = smov %s539_s14  ;;  %s723_s14 = smov %s627_s29 }
  0xd9   : > { %s724_s15 = smov %s618_s26  ;;  %19 = sbr.rel (!%p17_p3) target bundleno = 6 (0x6), region = 81 }
  0xde   :  { %276 = vsyncpa [#allocation3], 1 }
  0xdf   :  { %278 = vsyncpa [#allocation3 + $0x1], 1 }
  0xe0   :  { %279 = vsyncpa [#allocation6], 1 }
  0xe1   :  { %280 = vsyncpa [#allocation4], 1 }
  0xe2   :  { %282 = vsyncpa [#allocation4 + $0x1], 1 }

</bundles_post_ra>
